<compile_context>
chip_gen: v7x
topology: tpu7x:2x2x1
jax: 0.10.0
libtpu: 0.0.40
codegen_flags: <defaults>
</compile_context>

<pallas_src>
import functools

import jax
import jax.numpy as jnp
from jax.experimental import pallas as pl
from jax.experimental.pallas import tpu as pltpu

INPUT_DIM = 33
HIDDEN_DIM = 128
BN_EPS = 1e-5
MAX_TB = 2048  # per-tile VMEM stays ~a few MB; safe on v5e/v6e/v7x defaults


def _round_up(n, m):
    return ((n + m - 1) // m) * m


def _encoder_kernel(x_ref, wcat_ref, bcat_ref, w2_ref, w3_ref, w4_ref, bpack_ref, out_ref):
    x = x_ref[...]                                        # (TB, 33) f32

    # Layer 1 + residual projection fused: one (TB,33)x(33,256) f32 matmul.
    y = jnp.dot(x, wcat_ref[...], preferred_element_type=jnp.float32) + bcat_ref[...]

    # Residual slab goes straight to the output tile (lane-128-aligned split).
    out_ref[...] = y[:, HIDDEN_DIM:]

    h = jnp.maximum(y[:, :HIDDEN_DIM], 0.0)               # BN folded into layer 1, ReLU
    mm_dtype = w2_ref.dtype                               # bf16 on the fast path, f32 otherwise

    # TODO(synk): Dropout layers are identity (eval-mode semantics).
    # Layer 2 (BN folded) + ReLU.
    h = jnp.dot(h.astype(mm_dtype), w2_ref[...], preferred_element_type=jnp.float32)
    h = jnp.maximum(h + bpack_ref[0, :], 0.0)

    # Layer 3 (BN folded) + ReLU.
    h = jnp.dot(h.astype(mm_dtype), w3_ref[...], preferred_element_type=jnp.float32)
    h = jnp.maximum(h + bpack_ref[1, :], 0.0)

    # Layer 4 (plain Linear).
    h = jnp.dot(h.astype(mm_dtype), w4_ref[...], preferred_element_type=jnp.float32)
    h = h + bpack_ref[2, :]

    out_ref[...] += h


def make_params(key, input_dim=INPUT_DIM, hidden_dim=HIDDEN_DIM):
    """Deterministic synthetic parameters (eval-mode BN running stats)."""
    keys = jax.random.split(key, 22)
    ki = iter(range(22))

    def lin(in_d, out_d):
        kw = keys[next(ki)]
        kb = keys[next(ki)]
        # weight stored transposed: (in_d, out_d)
        w = jax.random.normal(kw, (in_d, out_d), jnp.float32) * (1.0 / jnp.sqrt(in_d))
        b = jax.random.normal(kb, (1, out_d), jnp.float32) * 0.01
        return w, b

    w1, b1 = lin(input_dim, hidden_dim)
    w2, b2 = lin(hidden_dim, hidden_dim)
    w3, b3 = lin(hidden_dim, hidden_dim)
    w4, b4 = lin(hidden_dim, hidden_dim)
    wr, br = lin(input_dim, hidden_dim)

    def bn(h):
        kg, kb2, km, kv = keys[next(ki)], keys[next(ki)], keys[next(ki)], keys[next(ki)]
        gamma = 1.0 + 0.1 * jax.random.normal(kg, (1, h), jnp.float32)
        beta = 0.1 * jax.random.normal(kb2, (1, h), jnp.float32)
        run_mean = 0.1 * jax.random.normal(km, (1, h), jnp.float32)
        run_var = 0.5 + jnp.abs(jax.random.normal(kv, (1, h), jnp.float32))
        return gamma, beta, run_mean, run_var

    g1, be1, m1, v1 = bn(hidden_dim)
    g2, be2, m2, v2 = bn(hidden_dim)
    g3, be3, m3, v3 = bn(hidden_dim)

    return dict(
        w1=w1, b1=b1, g1=g1, be1=be1, m1=m1, v1=v1,
        w2=w2, b2=b2, g2=g2, be2=be2, m2=m2, v2=v2,
        w3=w3, b3=b3, g3=g3, be3=be3, m3=m3, v3=v3,
        w4=w4, b4=b4, wr=wr, br=br,
    )


def fold_params(p, hidden_matmul_dtype=jnp.bfloat16):
    """Fold eval-mode BN into the preceding Linear; pack small arrays.

    Call once at parameter-load time (hoisted out of the per-step path).
    Layers 2-4 weights are stored in `hidden_matmul_dtype` (bf16 fast path);
    the layer-1 + residual fused weight stays f32.
    """
    def fold_bn(w, b, g, be, m, v):
        scale = g * jax.lax.rsqrt(v + BN_EPS)        # (1, H)
        return w * scale, (b - m) * scale + be        # (in, H), (1, H)

    w1f, b1f = fold_bn(p["w1"], p["b1"], p["g1"], p["be1"], p["m1"], p["v1"])
    w2f, b2f = fold_bn(p["w2"], p["b2"], p["g2"], p["be2"], p["m2"], p["v2"])
    w3f, b3f = fold_bn(p["w3"], p["b3"], p["g3"], p["be3"], p["m3"], p["v3"])

    # Layer-1 weight and residual-projection weight share the same LHS (x):
    # concatenate along the output axis -> one matmul in the kernel.
    wcat = jnp.concatenate([w1f, p["wr"]], axis=1).astype(jnp.float32)        # (33, 256)
    bcat = jnp.concatenate([b1f, p["br"]], axis=1).astype(jnp.float32)        # (1, 256)

    # Pack remaining per-layer biases into a single (3, 128) f32 array.
    bpack = jnp.concatenate([b2f, b3f, p["b4"]], axis=0).astype(jnp.float32)  # (3, 128)

    return dict(
        wcat=wcat,
        bcat=bcat,
        w2=w2f.astype(hidden_matmul_dtype),
        w3=w3f.astype(hidden_matmul_dtype),
        w4=p["w4"].astype(hidden_matmul_dtype),
        bpack=bpack,
    )


@jax.jit
def enhanced_structured_encoder(x, folded):
    """x: (B, input_dim) f32, folded: output of fold_params -> (B, hidden) f32."""
    B, in_dim = x.shape
    hidden = folded["w2"].shape[1]
    two_h = folded["wcat"].shape[1]

    # Batch tiling: large tiles amortize per-step overhead; >=2 grid steps for
    # bigger batches so v7x's two TensorCores both get work.
    if B <= 8:
        TB = 8
    else:
        TB = min(MAX_TB, _round_up(pl.cdiv(B, 2), 8))
    grid = (pl.cdiv(B, TB),)

    flops = 2 * B * (in_dim * two_h + 3 * hidden * hidden)
    w_bytes = folded["w2"].dtype.itemsize
    bytes_accessed = (
        4 * (B * in_dim + B * hidden)            # x in, out
        + 4 * (in_dim * two_h + two_h)           # wcat, bcat (f32)
        + w_bytes * 3 * hidden * hidden          # w2/w3/w4
        + 4 * 3 * hidden                         # packed biases
    )

    return pl.pallas_call(
        _encoder_kernel,
        out_shape=jax.ShapeDtypeStruct((B, hidden), jnp.float32),
        grid=grid,
        in_specs=[
            pl.BlockSpec((TB, in_dim), lambda i: (i, 0)),       # x: tiled over batch
            pl.BlockSpec((in_dim, two_h), lambda i: (0, 0)),    # wcat: resident
            pl.BlockSpec((1, two_h), lambda i: (0, 0)),         # bcat
            pl.BlockSpec((hidden, hidden), lambda i: (0, 0)),   # w2
            pl.BlockSpec((hidden, hidden), lambda i: (0, 0)),   # w3
            pl.BlockSpec((hidden, hidden), lambda i: (0, 0)),   # w4
            pl.BlockSpec((3, hidden), lambda i: (0, 0)),        # packed biases
        ],
        out_specs=pl.BlockSpec((TB, hidden), lambda i: (i, 0)),
        compiler_params=pltpu.CompilerParams(dimension_semantics=("parallel",)),
        cost_estimate=pl.CostEstimate(
            flops=flops, transcendentals=0, bytes_accessed=bytes_accessed),
    )(x, folded["wcat"], folded["bcat"], folded["w2"], folded["w3"], folded["w4"],
      folded["bpack"])


def _reference(x, p):
    """Pure-JAX reference (un-folded, eval-mode) for correctness checking."""
    def lin(h, w, b):
        return h @ w + b

    def bn(h, g, be, m, v):
        return (h - m) / jnp.sqrt(v + BN_EPS) * g + be

    h = jnp.maximum(bn(lin(x, p["w1"], p["b1"]), p["g1"], p["be1"], p["m1"], p["v1"]), 0.0)
    h = jnp.maximum(bn(lin(h, p["w2"], p["b2"]), p["g2"], p["be2"], p["m2"], p["v2"]), 0.0)
    h = jnp.maximum(bn(lin(h, p["w3"], p["b3"]), p["g3"], p["be3"], p["m3"], p["v3"]), 0.0)
    h = lin(h, p["w4"], p["b4"])
    return h + lin(x, p["wr"], p["br"])


if __name__ == "__main__":
    key = jax.random.PRNGKey(0)
    k_param, k_x = jax.random.split(key)

    B = 8
    params = make_params(k_param, INPUT_DIM, HIDDEN_DIM)
    x = jax.random.normal(k_x, (B, INPUT_DIM), jnp.float32)

    ref = _reference(x, params)

    # Exact-precision path (all-f32 weights): tight tolerance vs reference.
    folded_f32 = fold_params(params, hidden_matmul_dtype=jnp.float32)
    out_f32 = jax.block_until_ready(enhanced_structured_encoder(x, folded_f32))
    assert out_f32.shape == (B, HIDDEN_DIM)
    assert jnp.allclose(out_f32, ref, atol=2e-4, rtol=2e-4), "f32 path mismatch vs reference"

    # Fast path (bf16 hidden-layer weights/activations, f32 MXU accumulation):
    # looser tolerance commensurate with bf16 rounding.
    folded_bf16 = fold_params(params, hidden_matmul_dtype=jnp.bfloat16)
    out_bf16 = jax.block_until_ready(enhanced_structured_encoder(x, folded_bf16))
    assert out_bf16.shape == (B, HIDDEN_DIM)
    assert jnp.allclose(out_bf16, ref, atol=5e-2, rtol=5e-2), "bf16 path mismatch vs reference"

    print("KERNEL_OK")
</pallas_src>

<mosaic_0001>
module attributes {stable_mosaic.version = 11 : i64} {
  func.func @_encoder_kernel(%arg0: i32, %arg1: memref<8x33xf32, #tpu.memory_space<vmem>>, %arg2: memref<33x256xf32, #tpu.memory_space<vmem>>, %arg3: memref<1x256xf32, #tpu.memory_space<vmem>>, %arg4: memref<128x128xf32, #tpu.memory_space<vmem>>, %arg5: memref<128x128xf32, #tpu.memory_space<vmem>>, %arg6: memref<128x128xf32, #tpu.memory_space<vmem>>, %arg7: memref<3x128xf32, #tpu.memory_space<vmem>>, %arg8: memref<8x128xf32, #tpu.memory_space<vmem>>) attributes {dimension_semantics = [#tpu.dimension_semantics<parallel>], iteration_bounds = array<i64: 1>, scalar_prefetch = 0 : i64, scratch_operands = 0 : i64, tpu.core_type = #tpu.core_type<tc>, window_params = [{transform_indices = @transform_0, window_bounds = array<i64: 8, 33>}, {pipeline_mode = #tpu.pipeline_mode<synchronous>, transform_indices = @transform_1, window_bounds = array<i64: 33, 256>}, {pipeline_mode = #tpu.pipeline_mode<synchronous>, transform_indices = @transform_2, window_bounds = array<i64: 1, 256>}, {pipeline_mode = #tpu.pipeline_mode<synchronous>, transform_indices = @transform_3, window_bounds = array<i64: 128, 128>}, {pipeline_mode = #tpu.pipeline_mode<synchronous>, transform_indices = @transform_4, window_bounds = array<i64: 128, 128>}, {pipeline_mode = #tpu.pipeline_mode<synchronous>, transform_indices = @transform_5, window_bounds = array<i64: 128, 128>}, {pipeline_mode = #tpu.pipeline_mode<synchronous>, transform_indices = @transform_6, window_bounds = array<i64: 3, 128>}, {transform_indices = @transform_7, window_bounds = array<i64: 8, 128>}]} {
    %c0 = arith.constant 0 : index
    %c0_0 = arith.constant 0 : index
    %0 = vector.load %arg1[%c0, %c0_0] : memref<8x33xf32, #tpu.memory_space<vmem>>, vector<8x33xf32>
    %c0_1 = arith.constant 0 : index
    %c0_2 = arith.constant 0 : index
    %1 = vector.load %arg2[%c0_1, %c0_2] : memref<33x256xf32, #tpu.memory_space<vmem>>, vector<33x256xf32>
    %cst = arith.constant dense<0.000000e+00> : vector<8x256xf32>
    %2 = tpu.matmul %0, %1, %cst {dimension_numbers = #tpu.dot_dimension_numbers<[1], [0], [0], [1], [0, 0, 1, 1], [], []>} : vector<8x33xf32>, vector<33x256xf32>, vector<8x256xf32> -> vector<8x256xf32>
    %c0_3 = arith.constant 0 : index
    %c0_4 = arith.constant 0 : index
    %3 = vector.load %arg3[%c0_3, %c0_4] : memref<1x256xf32, #tpu.memory_space<vmem>>, vector<1x256xf32>
    %4 = vector.broadcast %3 : vector<1x256xf32> to vector<8x256xf32>
    %5 = arith.addf %2, %4 : vector<8x256xf32>
    %6 = vector.extract_strided_slice %5 {offsets = [0, 128], sizes = [8, 128], strides = [1, 1]} : vector<8x256xf32> to vector<8x128xf32>
    %c0_5 = arith.constant 0 : index
    %c0_6 = arith.constant 0 : index
    %7 = vector.load %arg8[%c0_5, %c0_6] : memref<8x128xf32, #tpu.memory_space<vmem>>, vector<8x128xf32>
    tpu.vector_store %arg8[%c0_5, %c0_6], %6 {strides = array<i32>} : memref<8x128xf32, #tpu.memory_space<vmem>>, vector<8x128xf32>,
    %8 = vector.extract_strided_slice %5 {offsets = [0, 0], sizes = [8, 128], strides = [1, 1]} : vector<8x256xf32> to vector<8x128xf32>
    %cst_7 = arith.constant 0.000000e+00 : f32
    %9 = vector.broadcast %cst_7 : f32 to vector<8x128xf32>
    %10 = arith.maximumf %8, %9 : vector<8x128xf32>
    %c0_8 = arith.constant 0 : index
    %c0_9 = arith.constant 0 : index
    %11 = vector.load %arg4[%c0_8, %c0_9] : memref<128x128xf32, #tpu.memory_space<vmem>>, vector<128x128xf32>
    %cst_10 = arith.constant dense<0.000000e+00> : vector<8x128xf32>
    %12 = tpu.matmul %10, %11, %cst_10 {dimension_numbers = #tpu.dot_dimension_numbers<[1], [0], [0], [1], [0, 0, 1, 1], [], []>} : vector<8x128xf32>, vector<128x128xf32>, vector<8x128xf32> -> vector<8x128xf32>
    %c0_11 = arith.constant 0 : index
    %c0_12 = arith.constant 0 : index
    %13 = vector.load %arg7[%c0_11, %c0_12] : memref<3x128xf32, #tpu.memory_space<vmem>>, vector<1x128xf32>
    %14 = vector.shape_cast %13 : vector<1x128xf32> to vector<128xf32>
    %15 = vector.shape_cast %14 : vector<128xf32> to vector<1x128xf32>
    %16 = vector.broadcast %15 : vector<1x128xf32> to vector<8x128xf32>
    %17 = arith.addf %12, %16 : vector<8x128xf32>
    %cst_13 = arith.constant 0.000000e+00 : f32
    %18 = vector.broadcast %cst_13 : f32 to vector<8x128xf32>
    %19 = arith.maximumf %17, %18 : vector<8x128xf32>
    %c0_14 = arith.constant 0 : index
    %c0_15 = arith.constant 0 : index
    %20 = vector.load %arg5[%c0_14, %c0_15] : memref<128x128xf32, #tpu.memory_space<vmem>>, vector<128x128xf32>
    %cst_16 = arith.constant dense<0.000000e+00> : vector<8x128xf32>
    %21 = tpu.matmul %19, %20, %cst_16 {dimension_numbers = #tpu.dot_dimension_numbers<[1], [0], [0], [1], [0, 0, 1, 1], [], []>} : vector<8x128xf32>, vector<128x128xf32>, vector<8x128xf32> -> vector<8x128xf32>
    %c1 = arith.constant 1 : index
    %c0_17 = arith.constant 0 : index
    %22 = vector.load %arg7[%c1, %c0_17] : memref<3x128xf32, #tpu.memory_space<vmem>>, vector<1x128xf32>
    %23 = vector.shape_cast %22 : vector<1x128xf32> to vector<128xf32>
    %24 = vector.shape_cast %23 : vector<128xf32> to vector<1x128xf32>
    %25 = vector.broadcast %24 : vector<1x128xf32> to vector<8x128xf32>
    %26 = arith.addf %21, %25 : vector<8x128xf32>
    %cst_18 = arith.constant 0.000000e+00 : f32
    %27 = vector.broadcast %cst_18 : f32 to vector<8x128xf32>
    %28 = arith.maximumf %26, %27 : vector<8x128xf32>
    %c0_19 = arith.constant 0 : index
    %c0_20 = arith.constant 0 : index
    %29 = vector.load %arg6[%c0_19, %c0_20] : memref<128x128xf32, #tpu.memory_space<vmem>>, vector<128x128xf32>
    %cst_21 = arith.constant dense<0.000000e+00> : vector<8x128xf32>
    %30 = tpu.matmul %28, %29, %cst_21 {dimension_numbers = #tpu.dot_dimension_numbers<[1], [0], [0], [1], [0, 0, 1, 1], [], []>} : vector<8x128xf32>, vector<128x128xf32>, vector<8x128xf32> -> vector<8x128xf32>
    %c2 = arith.constant 2 : index
    %c0_22 = arith.constant 0 : index
    %31 = vector.load %arg7[%c2, %c0_22] : memref<3x128xf32, #tpu.memory_space<vmem>>, vector<1x128xf32>
    %32 = vector.shape_cast %31 : vector<1x128xf32> to vector<128xf32>
    %33 = vector.shape_cast %32 : vector<128xf32> to vector<1x128xf32>
    %34 = vector.broadcast %33 : vector<1x128xf32> to vector<8x128xf32>
    %35 = arith.addf %30, %34 : vector<8x128xf32>
    %c0_23 = arith.constant 0 : index
    %c0_24 = arith.constant 0 : index
    %36 = vector.load %arg8[%c0_23, %c0_24] : memref<8x128xf32, #tpu.memory_space<vmem>>, vector<8x128xf32>
    %37 = arith.addf %36, %35 : vector<8x128xf32>
    %c0_25 = arith.constant 0 : index
    %c0_26 = arith.constant 0 : index
    %38 = vector.load %arg8[%c0_25, %c0_26] : memref<8x128xf32, #tpu.memory_space<vmem>>, vector<8x128xf32>
    tpu.vector_store %arg8[%c0_25, %c0_26], %37 {strides = array<i32>} : memref<8x128xf32, #tpu.memory_space<vmem>>, vector<8x128xf32>,
    return
  }
  func.func @transform_0(%arg0: i32) -> (i32, i32) {
    %c0_i32 = arith.constant 0 : i32
    %c0_i32_0 = arith.constant 0 : i32
    return %arg0, %c0_i32 : i32, i32
  }
  func.func @transform_1(%arg0: i32) -> (i32, i32) {
    %c0_i32 = arith.constant 0 : i32
    %c0_i32_0 = arith.constant 0 : i32
    %c0_i32_1 = arith.constant 0 : i32
    return %c0_i32, %c0_i32_0 : i32, i32
  }
  func.func @transform_2(%arg0: i32) -> (i32, i32) {
    %c0_i32 = arith.constant 0 : i32
    %c0_i32_0 = arith.constant 0 : i32
    %c0_i32_1 = arith.constant 0 : i32
    return %c0_i32, %c0_i32_0 : i32, i32
  }
  func.func @transform_3(%arg0: i32) -> (i32, i32) {
    %c0_i32 = arith.constant 0 : i32
    %c0_i32_0 = arith.constant 0 : i32
    %c0_i32_1 = arith.constant 0 : i32
    return %c0_i32, %c0_i32_0 : i32, i32
  }
  func.func @transform_4(%arg0: i32) -> (i32, i32) {
    %c0_i32 = arith.constant 0 : i32
    %c0_i32_0 = arith.constant 0 : i32
    %c0_i32_1 = arith.constant 0 : i32
    return %c0_i32, %c0_i32_0 : i32, i32
  }
  func.func @transform_5(%arg0: i32) -> (i32, i32) {
    %c0_i32 = arith.constant 0 : i32
    %c0_i32_0 = arith.constant 0 : i32
    %c0_i32_1 = arith.constant 0 : i32
    return %c0_i32, %c0_i32_0 : i32, i32
  }
  func.func @transform_6(%arg0: i32) -> (i32, i32) {
    %c0_i32 = arith.constant 0 : i32
    %c0_i32_0 = arith.constant 0 : i32
    %c0_i32_1 = arith.constant 0 : i32
    return %c0_i32, %c0_i32_0 : i32, i32
  }
  func.func @transform_7(%arg0: i32) -> (i32, i32) {
    %c0_i32 = arith.constant 0 : i32
    %c0_i32_0 = arith.constant 0 : i32
    return %arg0, %c0_i32 : i32, i32
  }
}

</mosaic_0001>

<bundles_post_ra>
// kernel: enhanced_structured_encoder.1
= control target key start
LH: loop header
LB: loop body
LE: loop exit
PB: predicated region body
PF: predicated region fallthrough
CT: control target
= control target key end

     0   :  { %12 = vsyncpa [#allocation3], 0  ;;  %s1078_s0 = inlined_call_operand.hbm [shape: f32[8,33], index: 0, kind: input, shape index: {}]   ;;  %s1079_s1 = inlined_call_operand.hbm [shape: f32[33,256], index: 1, kind: input, shape index: {}]   ;;  %s1080_s2 = inlined_call_operand.vmem [shape: f32[1,256], index: 2, kind: input, shape index: {}]   ;;  %s1081_s3 = inlined_call_operand.hbm [shape: f32[128,128], index: 3, kind: input, shape index: {}]   ;;  %s1082_s4 = inlined_call_operand.hbm [shape: f32[128,128], index: 4, kind: input, shape index: {}]   ;;  %s1083_s5 = inlined_call_operand.hbm [shape: f32[128,128], index: 5, kind: input, shape index: {}]   ;;  %s1084_s6 = inlined_call_operand.vmem [shape: f32[3,128], index: 6, kind: input, shape index: {}]   ;;  %s1085_s7 = inlined_call_operand.hbm [shape: f32[8,128], index: 7, kind: output, shape index: {}]  }
   0x1   :  { %13 = vsyncpa [#allocation6], 0 }
   0x2   :  { %14 = vsyncpa [#allocation9], 0 }
   0x3   :  { %15 = vsyncpa [#allocation4], 0  ;;  %s890_s24 = smov [#allocation5]   ;;  %s750_s28 = scalar_lea.hbm %s1079_s1, 1280 }
   0x4   :  { %s31_s25 = sshll.u32 %s890_s24, 4  ;;  %p751_p0 = scmp.ne.s32.totalorder %s1079_s1, %s750_s28  ;;  %s32_s25 = int_to_ptr.vmem [resolvable:$true] %s31_s25 }
   0x5   :  { %p754_p1 = scmp.lt.u32.totalorder %s750_s28, %s1079_s1 }
   0x7   :  { %p756_p2 = pnand %p754_p1, %p751_p0 }
   0x9   :  { %759 = shalt.err (!%p756_p2)
}
   0xa   :  { %s760_s10 = scalar_lea.vmem %s32_s25, 1280  ;;  %p765_p4 = scmp.lt.s32.totalorder %s32_s25, %s32_s25 }
   0xb   :  { %p761_p3 = scmp.ne.s32.totalorder %s32_s25, %s760_s10  ;;  %p766_p5 = scmp.lt.s32.totalorder %s760_s10, %s760_s10 }
   0xd   :  { %p767_p6 = por %p766_p5, %p765_p4 }
   0xf   :  { %p768_p7 = pnand %p767_p6, %p761_p3 }
  0x11   :  { %771 = shalt.err (!%p768_p7)
}
  0x12   :  { %s891_s11 = smov 256   ;;  %s892_s12 = smov 16  }
  0x13   :  { %37 = dma.hbm_to_vmem [thread:$0]  %s1079_s1, 1280, %s32_s25, [#allocation6], %s891_s11, %s891_s11, %s892_s12  }
  0x14   :  { %s893_s15 = smov [#allocation8]   ;;  %s894_s17 = smov [#allocation2]  }
  0x15   :  { %s57_s16 = sshll.u32 %s893_s15, 4  ;;  %s22_s18 = sshll.u32 %s894_s17, 4  ;;  %s58_s16 = int_to_ptr.vmem [resolvable:$true] %s57_s16  ;;  %s23_s18 = int_to_ptr.vmem [resolvable:$true] %s22_s18 }
  0x16   :  { %s772_s21 = scalar_lea.hbm %s1082_s4, 2048 }
  0x17   :  { %p773_p8 = scmp.ne.s32.totalorder %s1082_s4, %s772_s21  ;;  %p776_p9 = scmp.lt.u32.totalorder %s772_s21, %s1082_s4 }
  0x19   :  { %p778_p10 = pnand %p776_p9, %p773_p8 }
  0x1b   :  { %781 = shalt.err (!%p778_p10)
}
  0x1c   :  { %s782_s1 = scalar_lea.vmem %s58_s16, 2048  ;;  %p787_p12 = scmp.lt.s32.totalorder %s58_s16, %s58_s16 }
  0x1d   :  { %p783_p11 = scmp.ne.s32.totalorder %s58_s16, %s782_s1  ;;  %p788_p13 = scmp.lt.s32.totalorder %s782_s1, %s782_s1 }
  0x1f   :  { %p789_p0 = por %p788_p13, %p787_p12 }
  0x21   :  { %p790_p1 = pnand %p789_p0, %p783_p11 }
  0x23   :  { %793 = shalt.err (!%p790_p1)
}
  0x24   :  { %s895_s25 = smov 128   ;;  %s896_s27 = smov 8  }
  0x25   :  { %63 = dma.hbm_to_vmem [thread:$0]  %s1082_s4, 2048, %s58_s16, [#allocation9], %s895_s25, %s895_s25, %s896_s27  }
  0x26   :  { %s794_s9 = scalar_lea.hbm %s1078_s0, 128 }
  0x27   :  { %p795_p2 = scmp.ne.s32.totalorder %s1078_s0, %s794_s9  ;;  %p798_p3 = scmp.lt.u32.totalorder %s794_s9, %s1078_s0 }
  0x29   :  { %p800_p4 = pnand %p798_p3, %p795_p2 }
  0x2b   :  { %803 = shalt.err (!%p800_p4)
}
  0x2c   :  { %s804_s14 = scalar_lea.vmem %s23_s18, 128  ;;  %p809_p6 = scmp.lt.s32.totalorder %s23_s18, %s23_s18 }
  0x2d   :  { %p805_p5 = scmp.ne.s32.totalorder %s23_s18, %s804_s14  ;;  %p810_p7 = scmp.lt.s32.totalorder %s804_s14, %s804_s14 }
  0x2f   :  { %p811_p8 = por %p810_p7, %p809_p6 }
  0x31   :  { %p812_p9 = pnand %p811_p8, %p805_p5 }
  0x33   :  { %815 = shalt.err (!%p812_p9)
}
  0x34   :  { %25 = dma.hbm_to_vmem [thread:$0]  %s1078_s0, 128, %s23_s18, [#allocation3]  }
  0x35   :  { %s897_s16 = smov [#allocation7]   ;;  %s898_s19 = smov [#allocation10]  }
  0x36   :  { %s45_s17 = sshll.u32 %s897_s16, 4  ;;  %s69_s20 = sshll.u32 %s898_s19, 4  ;;  %s46_s17 = int_to_ptr.vmem [resolvable:$true] %s45_s17  ;;  %s70_s20 = int_to_ptr.vmem [resolvable:$true] %s69_s20 }
  0x37   :  { %s816_s23 = scalar_lea.hbm %s1081_s3, 2048 }
  0x38   :  { %p817_p10 = scmp.ne.s32.totalorder %s1081_s3, %s816_s23  ;;  %p820_p11 = scmp.lt.u32.totalorder %s816_s23, %s1081_s3 }
  0x3a   :  { %p822_p12 = pnand %p820_p11, %p817_p10 }
  0x3c   :  { %825 = shalt.err (!%p822_p12)
}
  0x3d   :  { %s826_s0 = scalar_lea.vmem %s46_s17, 2048  ;;  %p831_p0 = scmp.lt.s32.totalorder %s46_s17, %s46_s17 }
  0x3e   :  { %p827_p13 = scmp.ne.s32.totalorder %s46_s17, %s826_s0  ;;  %p832_p1 = scmp.lt.s32.totalorder %s826_s0, %s826_s0 }
  0x40   :  { %p833_p2 = por %p832_p1, %p831_p0 }
  0x42   :  { %p834_p3 = pnand %p833_p2, %p827_p13 }
  0x44   :  { %837 = shalt.err (!%p834_p3)
}
  0x45   :  { %51 = dma.hbm_to_vmem [thread:$0]  %s1081_s3, 2048, %s46_s17, [#allocation6], %s895_s25, %s895_s25, %s896_s27  }
  0x46   :  { %s838_s9 = scalar_lea.hbm %s1083_s5, 2048 }
  0x47   :  { %p839_p4 = scmp.ne.s32.totalorder %s1083_s5, %s838_s9  ;;  %p842_p5 = scmp.lt.u32.totalorder %s838_s9, %s1083_s5 }
  0x49   :  { %p844_p6 = pnand %p842_p5, %p839_p4 }
  0x4b   :  { %847 = shalt.err (!%p844_p6)
}
  0x4c   :  { %s848_s14 = scalar_lea.vmem %s70_s20, 2048  ;;  %p853_p8 = scmp.lt.s32.totalorder %s70_s20, %s70_s20 }
  0x4d   :  { %p849_p7 = scmp.ne.s32.totalorder %s70_s20, %s848_s14  ;;  %p854_p9 = scmp.lt.s32.totalorder %s848_s14, %s848_s14 }
  0x4f   :  { %p855_p10 = por %p854_p9, %p853_p8 }
  0x51   :  { %p856_p11 = pnand %p855_p10, %p849_p7 }
  0x53   :  { %859 = shalt.err (!%p856_p11)
}
  0x54   :  { %75 = dma.hbm_to_vmem [thread:$0]  %s1083_s5, 2048, %s70_s20, [#allocation9], %s895_s25, %s895_s25, %s896_s27  }
  0x55   :  { %882 = dma.done.wait [#allocation3], 128  }
  0x56   :  { %883 = vsyncadd [#allocation3], 4294967168 }
  0x57   :  { %884 = dma.done.wait [#allocation6], 3328  }
  0x58   :  { %885 = vsyncadd [#allocation6], 4294963968 }
  0x59   :  { %886 = dma.done.wait [#allocation9], 4096  }
  0x5a   :  { %887 = vsyncadd [#allocation9], 4294963200  ;;  %v899_v0 = vmov 0.0   ;;  %v900_v1 = vmov 0.0|0.0   ;;  %v95_v2 = vld [vmem:[#allocation5 + $0x8] sm:$0xff]  ;;  %v97_v3 = vld [vmem:[#allocation5 + $0x18] sm:$0xff]  ;;  %v106_v62 = vlaneseq }
  0x5b   :  { %191 = vmatprep.mubr.f32.mxu0 %v899_v0  ;;  %665 = vmatprep.subr.bf16.mxu1 %v900_v1  ;;  %v94_v4 = vld [vmem:[#allocation5] sm:$0xff]  ;;  %v657_v5 = vpack.c.bf16 %v97_v3, %v95_v2  ;;  %v96_v6 = vld [vmem:[#allocation5 + $0x10] sm:$0xff]  ;;  %v99_v7 = vld [vmem:[#allocation5 + $0x28] sm:$0xff]  ;;  %vm120_vm0 = vcmask 1040384   ;;  %vm116_vm1 = vcmask 269312   ;;  %vm901_vm2 = vmmov 0  }
  0x5c   :  { %v101_v8 = vld [vmem:[#allocation5 + $0x38] sm:$0xff]  ;;  %v659_v9 = vpack.c.bf16 %v96_v6, %v94_v4  ;;  %v98_v11 = vld [vmem:[#allocation5 + $0x20] sm:$0xff]  ;;  %v100_v12 = vld [vmem:[#allocation5 + $0x30] sm:$0xff]  ;;  %584 = vmatprep.mubr.msk.f32.mxu1 %vm901_vm2, %v899_v0  ;;  %v1034_v63 = vshrl.u32 %v106_v62, 7  ;;  %s902_s20 = smov [#allocation11]  }
  0x5d   :  { %v661_v10 = vpack.c.bf16 %v101_v8, %v99_v7  ;;  %658 = vmatprep.subr.bf16.mxu0 %v657_v5  ;;  %v200_v13 = vld [vmem:[#allocation7] sm:$0xff]  ;;  %v663_v14 = vpack.c.bf16 %v100_v12, %v98_v11  ;;  %v201_v15 = vld [vmem:[#allocation7 + $0x8] sm:$0xff]  ;;  %v202_v16 = vld [vmem:[#allocation7 + $0x10] sm:$0xff]  ;;  %s484_s21 = sshll.u32 %s902_s20, 4  ;;  %s485_s21 = int_to_ptr.vmem [resolvable:$true] %s484_s21 }
  0x5e   :  { %660 = vmatpush1.bf16.msra.mxu0 %v659_v9  ;;  %v203_v17 = vld [vmem:[#allocation7 + $0x18] sm:$0xff]  ;;  %v666_v18 = vpack.c.bf16 %v201_v15, %v200_v13  ;;  %v204_v21 = vld [vmem:[#allocation7 + $0x20] sm:$0xff]  ;;  %v205_v22 = vld [vmem:[#allocation7 + $0x28] sm:$0xff]  ;;  %v108_v2 = vsub.s32 0, %v1034_v63  ;;  %s860_s22 = scalar_lea.vmem %s485_s21, 128  ;;  %p865_p13 = scmp.lt.s32.totalorder %s485_s21, %s485_s21 }
  0x5f   :  { %662 = vmatprep.subr.bf16.mxu0 %v661_v10  ;;  %v103_v19 = vld [vmem:[#allocation5 + $0x48] sm:$0x1]  ;;  %v669_v20 = vpack.c.bf16 %v203_v17, %v202_v16  ;;  %v102_v23 = vld [vmem:[#allocation5 + $0x40] sm:$0x1]  ;;  %v93_v24 = vld [vmem:[#allocation2] sm:$0xff]  ;;  %v672_v25 = vpack.c.bf16 %v205_v22, %v204_v21  ;;  %p861_p12 = scmp.ne.s32.totalorder %s485_s21, %s860_s22  ;;  %p866_p0 = scmp.lt.s32.totalorder %s860_s22, %s860_s22 }
  0x60   :  { %667 = vmatpush3.bf16.msra.mxu1 %v666_v18  ;;  %v206_v26 = vld [vmem:[#allocation7 + $0x30] sm:$0xff]  ;;  %v207_v27 = vld [vmem:[#allocation7 + $0x38] sm:$0xff]  ;;  %v208_v29 = vld [vmem:[#allocation7 + $0x40] sm:$0xff] }
  0x61   :  { %668 = vmatprep.subr.bf16.mxu1 %v900_v1  ;;  %v675_v28 = vpack.c.bf16 %v207_v27, %v206_v26  ;;  %v209_v30 = vld [vmem:[#allocation7 + $0x48] sm:$0xff]  ;;  %v210_v32 = vld [vmem:[#allocation7 + $0x50] sm:$0xff]  ;;  %v211_v33 = vld [vmem:[#allocation7 + $0x58] sm:$0xff]  ;;  %p867_p1 = por %p866_p0, %p865_p13 }
  0x62   :  { %664 = vmatpush1.bf16.msra.mxu0 %v663_v14  ;;  %v678_v31 = vpack.c.bf16 %v209_v30, %v208_v29  ;;  %v681_v34 = vpack.c.bf16 %v211_v33, %v210_v32  ;;  %v212_v35 = vld [vmem:[#allocation7 + $0x60] sm:$0xff]  ;;  %v213_v36 = vld [vmem:[#allocation7 + $0x68] sm:$0xff]  ;;  %v214_v38 = vld [vmem:[#allocation7 + $0x70] sm:$0xff] }
  0x63   :  { %495 = vmatprep.subr.msk.mxu0 %vm120_vm0, %v103_v19  ;;  %v684_v37 = vpack.c.bf16 %v213_v36, %v212_v35  ;;  %v215_v39 = vld [vmem:[#allocation7 + $0x78] sm:$0xff]  ;;  %v292_v41 = vld [vmem:[#allocation8] sm:$0xff]  ;;  %v293_v42 = vld [vmem:[#allocation8 + $0x8] sm:$0xff]  ;;  %p868_p2 = pnand %p867_p1, %p861_p12 }
  0x64   :  { %670 = vmatpush3.bf16.msra.mxu1 %v669_v20  ;;  %v687_v40 = vpack.c.bf16 %v215_v39, %v214_v38  ;;  %v294_v43 = vld [vmem:[#allocation8 + $0x10] sm:$0xff]  ;;  %v690_v44 = vpack.c.bf16 %v293_v42, %v292_v41  ;;  %v295_v45 = vld [vmem:[#allocation8 + $0x18] sm:$0xff]  ;;  %v296_v47 = vld [vmem:[#allocation8 + $0x20] sm:$0xff] }
  0x65   :  { %671 = vmatprep.subr.bf16.mxu1 %v900_v1  ;;  %v693_v46 = vpack.c.bf16 %v295_v45, %v294_v43  ;;  %v297_v48 = vld [vmem:[#allocation8 + $0x28] sm:$0xff]  ;;  %v298_v50 = vld [vmem:[#allocation8 + $0x30] sm:$0xff]  ;;  %v299_v51 = vld [vmem:[#allocation8 + $0x38] sm:$0xff] }
  0x66   :  { %496 = vmatpush1.msk.msra.mxu0 %vm120_vm0, %v102_v23  ;;  %v696_v49 = vpack.c.bf16 %v297_v48, %v296_v47  ;;  %v699_v52 = vpack.c.bf16 %v299_v51, %v298_v50  ;;  %v300_v53 = vld [vmem:[#allocation8 + $0x40] sm:$0xff]  ;;  %v301_v54 = vld [vmem:[#allocation8 + $0x48] sm:$0xff]  ;;  %v302_v56 = vld [vmem:[#allocation8 + $0x50] sm:$0xff] }
  0x67   :  { %497 = vmatmul.mubr.msk.f32.vlgmr.msra.gmra.mrb[0].mxu0 %vm116_vm1, %v93_v24  ;;  %689 = vmatprep.subr.bf16.mxu0 %v900_v1  ;;  %v702_v55 = vpack.c.bf16 %v301_v54, %v300_v53  ;;  %v303_v57 = vld [vmem:[#allocation8 + $0x58] sm:$0xff]  ;;  %v304_v59 = vld [vmem:[#allocation8 + $0x60] sm:$0xff]  ;;  %v305_v60 = vld [vmem:[#allocation8 + $0x68] sm:$0xff] }
  0x68   :  { %673 = vmatpush3.bf16.msra.mxu1 %v672_v25  ;;  %619 = vmatprep.mubr.msk.f32.mxu0 %vm901_vm2, %v899_v0  ;;  %v705_v58 = vpack.c.bf16 %v303_v57, %v302_v56  ;;  %v708_v61 = vpack.c.bf16 %v305_v60, %v304_v59  ;;  %v1040_v3 = vld [vmem:[%s1080_s2] sm:$0x3]  ;;  %v306_v9 = vld [vmem:[#allocation8 + $0x70] sm:$0xff]  ;;  %v307_v10 = vld [vmem:[#allocation8 + $0x78] sm:$0xff] }
  0x69   :  { %674 = vmatprep.subr.bf16.mxu1 %v900_v1  ;;  %691 = vmatpush3.bf16.msra.mxu0 %v690_v44  ;;  %v109_v4 = vrot.slane %v1040_v3, %v108_v2  ;;  %v711_v11 = vpack.c.bf16 %v307_v10, %v306_v9  ;;  %v384_v12 = vld [vmem:[#allocation10] sm:$0xff]  ;;  %v385_v13 = vld [vmem:[#allocation10 + $0x8] sm:$0xff]  ;;  %v386_v14 = vld [vmem:[#allocation10 + $0x10] sm:$0xff]  ;;  %v112_v44 = vsub.s32 1, %v1034_v63 }
  0x6a   :  { %692 = vmatprep.subr.bf16.mxu0 %v900_v1  ;;  %v714_v15 = vpack.c.bf16 %v385_v13, %v384_v12  ;;  %v387_v16 = vld [vmem:[#allocation10 + $0x18] sm:$0xff]  ;;  %v388_v18 = vld [vmem:[#allocation10 + $0x20] sm:$0xff]  ;;  %v389_v19 = vld [vmem:[#allocation10 + $0x28] sm:$0xff] }
  0x6b   :  { %v717_v17 = vpack.c.bf16 %v387_v16, %v386_v14  ;;  %v720_v20 = vpack.c.bf16 %v389_v19, %v388_v18  ;;  %v391_v21 = vld [vmem:[#allocation10 + $0x38] sm:$0xff]  ;;  %v392_v23 = vld [vmem:[#allocation10 + $0x40] sm:$0xff]  ;;  %v393_v24 = vld [vmem:[#allocation10 + $0x48] sm:$0xff]  ;;  %v113_v45 = vrot.slane %v1040_v3, %v112_v44 }
  0x6c   :  { %676 = vmatpush3.bf16.msra.mxu1 %v675_v28  ;;  %v726_v25 = vpack.c.bf16 %v393_v24, %v392_v23  ;;  %v394_v26 = vld [vmem:[#allocation10 + $0x50] sm:$0xff]  ;;  %v395_v27 = vld [vmem:[#allocation10 + $0x58] sm:$0xff]  ;;  %v396_v29 = vld [vmem:[#allocation10 + $0x60] sm:$0xff] }
  0x6d   :  { %677 = vmatprep.subr.bf16.mxu1 %v900_v1  ;;  %694 = vmatpush3.bf16.msra.mxu0 %v693_v46  ;;  %v729_v28 = vpack.c.bf16 %v395_v27, %v394_v26  ;;  %v397_v30 = vld [vmem:[#allocation10 + $0x68] sm:$0xff]  ;;  %v399_v38 = vld [vmem:[#allocation10 + $0x78] sm:$0xff] }
  0x6e   :  { %695 = vmatprep.subr.bf16.mxu0 %v900_v1  ;;  %v498_v32 = vld [vmem:[%s1084_s6] ss:$0 sm:$0xff]  ;;  %v500_v46 = vld [vmem:[%s1084_s6 + $0x2] ss:$0 sm:$0xff] }
  0x70   :  { %679 = vmatpush3.bf16.msra.mxu1 %v678_v31  ;;  %v732_v31 = vpack.c.bf16 %v397_v30, %v396_v29 }
  0x71   :  { %680 = vmatprep.subr.bf16.mxu1 %v900_v1  ;;  %697 = vmatpush3.bf16.msra.mxu0 %v696_v49 }
  0x72   :  { %698 = vmatprep.subr.bf16.mxu0 %v900_v1 }
  0x74   :  { %682 = vmatpush3.bf16.msra.mxu1 %v681_v34 }
  0x75   :  { %683 = vmatprep.subr.bf16.mxu1 %v900_v1  ;;  %700 = vmatpush3.bf16.msra.mxu0 %v699_v52 }
  0x76   :  { %701 = vmatprep.subr.bf16.mxu0 %v900_v1 }
  0x78   :  { %685 = vmatpush3.bf16.msra.mxu1 %v684_v37  ;;  %v398_v37 = vld [vmem:[#allocation10 + $0x70] sm:$0xff] }
  0x79   :  { %686 = vmatprep.subr.bf16.mxu1 %v900_v1  ;;  %703 = vmatpush3.bf16.msra.mxu0 %v702_v55  ;;  %v735_v39 = vpack.c.bf16 %v399_v38, %v398_v37 }
  0x7a   :  { %704 = vmatprep.subr.bf16.mxu0 %v900_v1 }
  0x7c   :  { %688 = vmatpush3.bf16.msra.mxu1 %v687_v40  ;;  %v499_v40 = vld [vmem:[%s1084_s6 + $0x1] ss:$0 sm:$0xff] }
  0x7d   :  { %713 = vmatprep.subr.bf16.mxu1 %v900_v1  ;;  %706 = vmatpush3.bf16.msra.mxu0 %v705_v58 }
  0x7e   :  { %707 = vmatprep.subr.bf16.mxu0 %v900_v1 }
  0x81   :  { %709 = vmatpush3.bf16.msra.mxu0 %v708_v61 }
  0x82   :  { %710 = vmatprep.subr.bf16.mxu0 %v900_v1 }
  0x85   :  { %712 = vmatpush3.bf16.msra.mxu0 %v711_v11 }
 0x13a   :  { %v193_v5 = vpop.f32.mrb[0].mxu0 }
 0x13b   :  { %v194_v6 = vadd.f32 %v193_v5, %v109_v4  ;;  %v1043_v7 = vpop.f32.mrb[1].mxu0 }
 0x13c   :  { %v196_v48 = vadd.f32 %v1043_v7, %v113_v45 }
 0x13d   :  { %v199_v8 = vmax.f32 %v194_v6, 0.0 }
 0x13f   :  { %585 = vmatmul.mubr.f32.vlgmr.msra.gmra.mrb[0].mxu1 %v199_v8 }
 0x140   :  { %654 = vmatprep.mubr.msk.f32.mxu1 %vm901_vm2, %v899_v0  ;;  %715 = vmatpush3.bf16.msra.mxu1 %v714_v15  ;;  %v390_v0 = vld [vmem:[#allocation10 + $0x30] sm:$0xff] }
 0x141   :  { %716 = vmatprep.subr.bf16.mxu1 %v900_v1  ;;  %v723_v22 = vpack.c.bf16 %v391_v21, %v390_v0 }
 0x144   :  { %718 = vmatpush3.bf16.msra.mxu1 %v717_v17 }
 0x145   :  { %719 = vmatprep.subr.bf16.mxu1 %v900_v1 }
 0x148   :  { %721 = vmatpush3.bf16.msra.mxu1 %v720_v20 }
 0x149   :  { %722 = vmatprep.subr.bf16.mxu1 %v900_v1 }
 0x14c   :  { %724 = vmatpush3.bf16.msra.mxu1 %v723_v22 }
 0x14d   :  { %725 = vmatprep.subr.bf16.mxu1 %v900_v1 }
 0x150   :  { %727 = vmatpush3.bf16.msra.mxu1 %v726_v25 }
 0x151   :  { %728 = vmatprep.subr.bf16.mxu1 %v900_v1 }
 0x154   :  { %730 = vmatpush3.bf16.msra.mxu1 %v729_v28 }
 0x155   :  { %731 = vmatprep.subr.bf16.mxu1 %v900_v1 }
 0x158   :  { %733 = vmatpush3.bf16.msra.mxu1 %v732_v31 }
 0x159   :  { %734 = vmatprep.subr.bf16.mxu1 %v900_v1 }
 0x15c   :  { %736 = vmatpush3.bf16.msra.mxu1 %v735_v39 }
 0x212   :  { %v287_v33 = vpop.f32.mrb[0].mxu1 }
 0x213   :  { %v288_v34 = vadd.f32 %v498_v32, %v287_v33  ;;  %v586_v35 = vpop.f32.mrb[1].mxu1 }
 0x215   :  { %v291_v36 = vmax.f32 %v288_v34, 0.0 }
 0x217   :  { %620 = vmatmul.mubr.f32.vlgmr.msra.gmra.mrb[2].mxu0 %v291_v36 }
 0x2ea   :  { %v379_v41 = vpop.f32.mrb[2].mxu0 }
 0x2eb   :  { %v380_v42 = vadd.f32 %v499_v40, %v379_v41  ;;  %v621_v1 = vpop.f32.mrb[3].mxu0 }
 0x2ed   :  { %v383_v43 = vmax.f32 %v380_v42, 0.0 }
 0x2ef   :  { %655 = vmatmul.mubr.f32.vlgmr.msra.gmra.mrb[2].mxu1 %v383_v43 }
 0x3c2   :  { %v471_v47 = vpop.f32.mrb[2].mxu1 }
 0x3c3   :  { %v472_v49 = vadd.f32 %v500_v46, %v471_v47  ;;  %v656_v50 = vpop.f32.mrb[3].mxu1 }
 0x3c5   :  { %v476_v51 = vadd.f32 %v472_v49, %v196_v48 }
 0x3c7   :  { %477 = vst [vmem:[#allocation11] sm:$0xff] %v476_v51 }
 0x3c8   :  { %871 = shalt.err (!%p868_p2)
}
 0x3c9   :  { %s872_s6 = scalar_lea.hbm %s1085_s7, 128 }
 0x3ca   :  { %p873_p3 = scmp.ne.s32.totalorder %s1085_s7, %s872_s6  ;;  %p876_p4 = scmp.lt.u32.totalorder %s872_s6, %s1085_s7 }
 0x3cc   :  { %p878_p5 = pnand %p876_p4, %p873_p3 }
 0x3ce   :  { %881 = shalt.err (!%p878_p5)
}
 0x3cf   :  { %487 = dma.vmem_to_hbm [thread:$0]  %s485_s21, 128, %s1085_s7, [#allocation4]  }
 0x3d0   :  { %888 = dma.done.wait [#allocation4], 128  }
 0x3d1   :  { %889 = vsyncadd [#allocation4], 4294967168 }
 0x3d2   :  { %491 = vsyncpa [#allocation3], 1 }
 0x3d3   :  { %492 = vsyncpa [#allocation6], 1 }
 0x3d4   :  { %493 = vsyncpa [#allocation9], 1 }
 0x3d5   :  { %494 = vsyncpa [#allocation4], 1 }

</bundles_post_ra>
